<compile_context>
chip_gen: v6e
topology: v6e:2x2x1
jax: 0.10.0
libtpu: 0.0.40
codegen_flags: <defaults>
</compile_context>

<pallas_src>
import jax
import jax.numpy as jnp
from jax.experimental import pallas as pl
from jax.experimental.pallas import tpu as pltpu

HIDDEN = 64   # fc1 / fc2 width
OUT = 2       # fc3 logits
OUT_PAD = 8   # logits padded to one sublane tile; rows OUT..7 are zero and dropped host-side
K_PAD = 16    # 11 input features padded to 16 (clean sublane tile for both f32 and bf16)


def _round_up(n, m):
    return (n + m - 1) // m * m


def _cdiv(a, b):
    return (a + b - 1) // b


def mlp_kernel(x_ref, w1_ref, w2_ref, w3_ref, b1_ref, b2_ref, b3_ref, o_ref):
    """One batch tile of the fused 3-layer MLP, feature-major ("batch in lanes").

    x_ref  : (K_PAD, tb)       compute dtype (bf16 or f32); rows >= 11 are zero
    w1_ref : (HIDDEN, K_PAD)   resident; columns >= 11 are zero
    w2_ref : (HIDDEN, HIDDEN)  resident
    w3_ref : (OUT_PAD, HIDDEN) resident; rows >= OUT are zero
    b1_ref : (HIDDEN, 1)   f32 resident
    b2_ref : (HIDDEN, 1)   f32 resident
    b3_ref : (OUT_PAD, 1)  f32 resident; rows >= OUT are zero
    o_ref  : (OUT_PAD, tb) f32 logits (lane-dense store; rows >= OUT are padding)
    """
    dt = w1_ref.dtype

    # fc1 + ReLU  (f32 MXU accumulation; bias/ReLU in f32 -- v5e VPU has no bf16)
    h = jnp.dot(w1_ref[...], x_ref[...], preferred_element_type=jnp.float32)
    h = jnp.maximum(h + b1_ref[...], 0.0)
    # Dropout(p=0.2): identity in eval/inference mode.
    # TODO(synk): training-mode dropout would use pltpu.prng_seed + pltpu.prng_random_bits masking.

    # fc2 + ReLU
    h = jnp.dot(w2_ref[...], h.astype(dt), preferred_element_type=jnp.float32)
    h = jnp.maximum(h + b2_ref[...], 0.0)

    # fc3 (logits, no activation); rows OUT..OUT_PAD-1 come out zero (zero weight/bias rows).
    logits = jnp.dot(w3_ref[...], h.astype(dt), preferred_element_type=jnp.float32) + b3_ref[...]
    o_ref[...] = logits.astype(o_ref.dtype)


def pack_params(params, compute_dtype=jnp.float32):
    """One-time, host-side repack of (w1,b1,w2,b2,w3,b3) into feature-major padded operands."""
    w1, b1, w2, b2, w3, b3 = params          # w1: (k_in, 64), w2: (64, 64), w3: (64, 2)
    k_in = w1.shape[0]
    assert k_in <= K_PAD

    w1t = jnp.zeros((HIDDEN, K_PAD), jnp.float32).at[:, :k_in].set(w1.T).astype(compute_dtype)
    w2t = w2.T.astype(compute_dtype)
    w3t = jnp.zeros((OUT_PAD, HIDDEN), jnp.float32).at[:OUT, :].set(w3.T).astype(compute_dtype)

    b1c = b1.reshape(HIDDEN, 1).astype(jnp.float32)      # biases stay f32
    b2c = b2.reshape(HIDDEN, 1).astype(jnp.float32)
    b3c = jnp.zeros((OUT_PAD, 1), jnp.float32).at[:OUT, 0].set(b3)
    return (w1t, w2t, w3t, b1c, b2c, b3c)


def net_forward(x, packed, *, block_b=8192):
    """Fused MLP over an arbitrary batch. x: (B, k_in) f32. Returns f32 logits (B, OUT)."""
    B, k_in = x.shape
    w1t, w2t, w3t, b1c, b2c, b3c = packed
    cdt = w1t.dtype
    assert k_in <= K_PAD

    # Batch tile: large (amortizes ~0.35 us/step), multiple of 128 lanes, and sized so that for
    # moderate/large B the grid has >= 2 steps (v7x megacore sharding of the 'parallel' axis).
    tb = min(block_b, max(128, _round_up(_cdiv(B, 2), 128)))
    b_pad = _round_up(B, tb)
    n_steps = b_pad // tb

    # Single fused transpose + pad + (optional) cast into feature-major layout.  In production this
    # should fuse into x's producer (or x should arrive pre-transposed); it replaces the previous
    # batch-major pad+cast pass and is what buys lane-dense loads/stores and full MXU fill.
    x_t = jnp.zeros((K_PAD, b_pad), cdt).at[:k_in, :B].set(x.T.astype(cdt))

    flops = 2 * b_pad * (K_PAD * HIDDEN + HIDDEN * HIDDEN + HIDDEN * OUT_PAD)
    bytes_accessed = int(
        x_t.size * x_t.dtype.itemsize
        + OUT_PAD * b_pad * 4
        + sum(a.size * a.dtype.itemsize for a in packed)
    )

    resident = lambda i: (0, 0)   # constant block index -> fetched once, VMEM-resident

    out = pl.pallas_call(
        mlp_kernel,
        out_shape=jax.ShapeDtypeStruct((OUT_PAD, b_pad), jnp.float32),
        grid=(n_steps,),
        in_specs=[
            # x: tiled along batch (lane axis) -> automatic double-buffered DMA per grid step.
            pl.BlockSpec((K_PAD, tb), lambda i: (0, i)),
            pl.BlockSpec((HIDDEN, K_PAD), resident),
            pl.BlockSpec((HIDDEN, HIDDEN), resident),
            pl.BlockSpec((OUT_PAD, HIDDEN), resident),
            pl.BlockSpec((HIDDEN, 1), resident),
            pl.BlockSpec((HIDDEN, 1), resident),
            pl.BlockSpec((OUT_PAD, 1), resident),
        ],
        out_specs=pl.BlockSpec((OUT_PAD, tb), lambda i: (0, i)),
        compiler_params=pltpu.CompilerParams(
            # Batch tiles are independent: shard grid steps across v7x's two TensorCores.
            dimension_semantics=("parallel",),
        ),
        cost_estimate=pl.CostEstimate(
            flops=flops, transcendentals=0, bytes_accessed=bytes_accessed),
    )(x_t, w1t, w2t, w3t, b1c, b2c, b3c)

    # Drop padded logit rows / batch columns; return batch-major (B, OUT) f32 (8 bytes/row).
    return out[:OUT, :B].T


def init_params(key, input_size, hidden=HIDDEN, out=OUT):
    # Mimics PyTorch nn.Linear default init: U(-1/sqrt(fan_in), +1/sqrt(fan_in)).
    def linear(k, fan_in, fan_out):
        kw, kb = jax.random.split(k)
        bound = 1.0 / jnp.sqrt(fan_in)
        W = jax.random.uniform(kw, (fan_in, fan_out), jnp.float32, -bound, bound)
        b = jax.random.uniform(kb, (fan_out,), jnp.float32, -bound, bound)
        return W, b

    k1, k2, k3 = jax.random.split(key, 3)
    w1, b1 = linear(k1, input_size, hidden)
    w2, b2 = linear(k2, hidden, hidden)
    w3, b3 = linear(k3, hidden, out)
    return (w1, b1, w2, b2, w3, b3)


if __name__ == "__main__":
    key = jax.random.PRNGKey(0)
    kx, kp = jax.random.split(key)

    input_size = 11   # Churn Modelling feature count (X_train.shape[1])
    batch = 8

    x = jax.random.normal(kx, (batch, input_size), jnp.float32)
    params = init_params(kp, input_size)

    # Pure-JAX f32 reference (eval mode: dropout = identity).
    w1, b1, w2, b2, w3, b3 = params
    ref = jnp.maximum(x @ w1 + b1, 0.0)
    ref = jnp.maximum(ref @ w2 + b2, 0.0)
    ref = ref @ w3 + b3

    # f32 path: faithful to PyTorch fp32 semantics.
    out_f32 = net_forward(x, pack_params(params, jnp.float32))
    jax.block_until_ready(out_f32)
    assert out_f32.shape == (batch, OUT)
    assert jnp.allclose(out_f32, ref, atol=1e-4, rtol=1e-4)

    # bf16 fast path (f32 MXU accumulation) -- recommended production config.
    # Hidden activations are rounded to bf16 between layers (documented deviation from fp32).
    out_bf16 = net_forward(x, pack_params(params, jnp.bfloat16))
    jax.block_until_ready(out_bf16)
    assert out_bf16.shape == (batch, OUT)
    assert jnp.allclose(out_bf16, ref, atol=5e-2, rtol=5e-2)

    print("KERNEL_OK")
</pallas_src>

<mosaic_0001>
module attributes {stable_mosaic.version = 11 : i64} {
  func.func @mlp_kernel(%arg0: i32, %arg1: memref<16x128xf32, #tpu.memory_space<vmem>>, %arg2: memref<64x16xf32, #tpu.memory_space<vmem>>, %arg3: memref<64x64xf32, #tpu.memory_space<vmem>>, %arg4: memref<8x64xf32, #tpu.memory_space<vmem>>, %arg5: memref<64x1xf32, #tpu.memory_space<vmem>>, %arg6: memref<64x1xf32, #tpu.memory_space<vmem>>, %arg7: memref<8x1xf32, #tpu.memory_space<vmem>>, %arg8: memref<8x128xf32, #tpu.memory_space<vmem>>) attributes {dimension_semantics = [#tpu.dimension_semantics<parallel>], iteration_bounds = array<i64: 1>, scalar_prefetch = 0 : i64, scratch_operands = 0 : i64, tpu.core_type = #tpu.core_type<tc>, window_params = [{transform_indices = @transform_0, window_bounds = array<i64: 16, 128>}, {pipeline_mode = #tpu.pipeline_mode<synchronous>, transform_indices = @transform_1, window_bounds = array<i64: 64, 16>}, {pipeline_mode = #tpu.pipeline_mode<synchronous>, transform_indices = @transform_2, window_bounds = array<i64: 64, 64>}, {pipeline_mode = #tpu.pipeline_mode<synchronous>, transform_indices = @transform_3, window_bounds = array<i64: 8, 64>}, {pipeline_mode = #tpu.pipeline_mode<synchronous>, transform_indices = @transform_4, window_bounds = array<i64: 64, 1>}, {pipeline_mode = #tpu.pipeline_mode<synchronous>, transform_indices = @transform_5, window_bounds = array<i64: 64, 1>}, {pipeline_mode = #tpu.pipeline_mode<synchronous>, transform_indices = @transform_6, window_bounds = array<i64: 8, 1>}, {transform_indices = @transform_7, window_bounds = array<i64: 8, 128>}]} {
    %c0 = arith.constant 0 : index
    %c0_0 = arith.constant 0 : index
    %0 = vector.load %arg2[%c0, %c0_0] : memref<64x16xf32, #tpu.memory_space<vmem>>, vector<64x16xf32>
    %c0_1 = arith.constant 0 : index
    %c0_2 = arith.constant 0 : index
    %1 = vector.load %arg1[%c0_1, %c0_2] : memref<16x128xf32, #tpu.memory_space<vmem>>, vector<16x128xf32>
    %cst = arith.constant dense<0.000000e+00> : vector<64x128xf32>
    %2 = tpu.matmul %0, %1, %cst {dimension_numbers = #tpu.dot_dimension_numbers<[1], [0], [0], [1], [0, 0, 1, 1], [], []>} : vector<64x16xf32>, vector<16x128xf32>, vector<64x128xf32> -> vector<64x128xf32>
    %c0_3 = arith.constant 0 : index
    %c0_4 = arith.constant 0 : index
    %3 = vector.load %arg5[%c0_3, %c0_4] : memref<64x1xf32, #tpu.memory_space<vmem>>, vector<64x1xf32>
    %4 = vector.broadcast %3 : vector<64x1xf32> to vector<64x128xf32>
    %5 = arith.addf %2, %4 : vector<64x128xf32>
    %cst_5 = arith.constant 0.000000e+00 : f32
    %6 = vector.broadcast %cst_5 : f32 to vector<64x128xf32>
    %7 = arith.maximumf %5, %6 : vector<64x128xf32>
    %c0_6 = arith.constant 0 : index
    %c0_7 = arith.constant 0 : index
    %8 = vector.load %arg3[%c0_6, %c0_7] : memref<64x64xf32, #tpu.memory_space<vmem>>, vector<64x64xf32>
    %cst_8 = arith.constant dense<0.000000e+00> : vector<64x128xf32>
    %9 = tpu.matmul %8, %7, %cst_8 {dimension_numbers = #tpu.dot_dimension_numbers<[1], [0], [0], [1], [0, 0, 1, 1], [], []>} : vector<64x64xf32>, vector<64x128xf32>, vector<64x128xf32> -> vector<64x128xf32>
    %c0_9 = arith.constant 0 : index
    %c0_10 = arith.constant 0 : index
    %10 = vector.load %arg6[%c0_9, %c0_10] : memref<64x1xf32, #tpu.memory_space<vmem>>, vector<64x1xf32>
    %11 = vector.broadcast %10 : vector<64x1xf32> to vector<64x128xf32>
    %12 = arith.addf %9, %11 : vector<64x128xf32>
    %cst_11 = arith.constant 0.000000e+00 : f32
    %13 = vector.broadcast %cst_11 : f32 to vector<64x128xf32>
    %14 = arith.maximumf %12, %13 : vector<64x128xf32>
    %c0_12 = arith.constant 0 : index
    %c0_13 = arith.constant 0 : index
    %15 = vector.load %arg4[%c0_12, %c0_13] : memref<8x64xf32, #tpu.memory_space<vmem>>, vector<8x64xf32>
    %cst_14 = arith.constant dense<0.000000e+00> : vector<8x128xf32>
    %16 = tpu.matmul %15, %14, %cst_14 {dimension_numbers = #tpu.dot_dimension_numbers<[1], [0], [0], [1], [0, 0, 1, 1], [], []>} : vector<8x64xf32>, vector<64x128xf32>, vector<8x128xf32> -> vector<8x128xf32>
    %c0_15 = arith.constant 0 : index
    %c0_16 = arith.constant 0 : index
    %17 = vector.load %arg7[%c0_15, %c0_16] : memref<8x1xf32, #tpu.memory_space<vmem>>, vector<8x1xf32>
    %18 = vector.broadcast %17 : vector<8x1xf32> to vector<8x128xf32>
    %19 = arith.addf %16, %18 : vector<8x128xf32>
    %c0_17 = arith.constant 0 : index
    %c0_18 = arith.constant 0 : index
    %20 = vector.load %arg8[%c0_17, %c0_18] : memref<8x128xf32, #tpu.memory_space<vmem>>, vector<8x128xf32>
    tpu.vector_store %arg8[%c0_17, %c0_18], %19 {strides = array<i32>} : memref<8x128xf32, #tpu.memory_space<vmem>>, vector<8x128xf32>,
    return
  }
  func.func @transform_0(%arg0: i32) -> (i32, i32) {
    %c0_i32 = arith.constant 0 : i32
    %c0_i32_0 = arith.constant 0 : i32
    return %c0_i32, %arg0 : i32, i32
  }
  func.func @transform_1(%arg0: i32) -> (i32, i32) {
    %c0_i32 = arith.constant 0 : i32
    %c0_i32_0 = arith.constant 0 : i32
    %c0_i32_1 = arith.constant 0 : i32
    return %c0_i32, %c0_i32_0 : i32, i32
  }
  func.func @transform_2(%arg0: i32) -> (i32, i32) {
    %c0_i32 = arith.constant 0 : i32
    %c0_i32_0 = arith.constant 0 : i32
    %c0_i32_1 = arith.constant 0 : i32
    return %c0_i32, %c0_i32_0 : i32, i32
  }
  func.func @transform_3(%arg0: i32) -> (i32, i32) {
    %c0_i32 = arith.constant 0 : i32
    %c0_i32_0 = arith.constant 0 : i32
    %c0_i32_1 = arith.constant 0 : i32
    return %c0_i32, %c0_i32_0 : i32, i32
  }
  func.func @transform_4(%arg0: i32) -> (i32, i32) {
    %c0_i32 = arith.constant 0 : i32
    %c0_i32_0 = arith.constant 0 : i32
    %c0_i32_1 = arith.constant 0 : i32
    return %c0_i32, %c0_i32_0 : i32, i32
  }
  func.func @transform_5(%arg0: i32) -> (i32, i32) {
    %c0_i32 = arith.constant 0 : i32
    %c0_i32_0 = arith.constant 0 : i32
    %c0_i32_1 = arith.constant 0 : i32
    return %c0_i32, %c0_i32_0 : i32, i32
  }
  func.func @transform_6(%arg0: i32) -> (i32, i32) {
    %c0_i32 = arith.constant 0 : i32
    %c0_i32_0 = arith.constant 0 : i32
    %c0_i32_1 = arith.constant 0 : i32
    return %c0_i32, %c0_i32_0 : i32, i32
  }
  func.func @transform_7(%arg0: i32) -> (i32, i32) {
    %c0_i32 = arith.constant 0 : i32
    %c0_i32_0 = arith.constant 0 : i32
    return %c0_i32, %arg0 : i32, i32
  }
}

</mosaic_0001>

<bundles_post_ra>
// kernel: tpu_custom_call.1
= control target key start
LH: loop header
LB: loop body
LE: loop exit
PB: predicated region body
PF: predicated region fallthrough
CT: control target
= control target key end

     0   :  { %vm85_vm0 = vcmask 130048   ;;  %v655_v4 = vmov 0   ;;  %s827_s0 = inlined_call_operand.vmem [shape: f32[16,128], index: 0, kind: input, shape index: {}]   ;;  %s828_s1 = inlined_call_operand.vmem [shape: f32[64,16], index: 1, kind: input, shape index: {}]   ;;  %s829_s2 = inlined_call_operand.vmem [shape: f32[64,64], index: 2, kind: input, shape index: {}]   ;;  %s830_s3 = inlined_call_operand.vmem [shape: f32[8,64], index: 3, kind: input, shape index: {}]   ;;  %s831_s4 = inlined_call_operand.vmem [shape: f32[64,1], index: 4, kind: input, shape index: {}]   ;;  %s832_s5 = inlined_call_operand.vmem [shape: f32[64,1], index: 5, kind: input, shape index: {}]   ;;  %s833_s6 = inlined_call_operand.vmem [shape: f32[8,1], index: 6, kind: input, shape index: {}]   ;;  %s834_s7 = inlined_call_operand.hbm [shape: f32[8,128], index: 7, kind: output, shape index: {}]  }
   0x1   :  { %v36_v0 = vld [vmem:[%s827_s0 + $0x8] sm:$0xff]  ;;  %v35_v1 = vld [vmem:[%s827_s0] sm:$0xff]  ;;  %631 = vset.pattern.permute.xlu0 %v655_v4  ;;  %v29_v5 = vld [vmem:[%s828_s1 + $0x10] sm:$0xff]  ;;  %632 = vset.pattern.permute.xlu1 %v655_v4 }
   0x2   :  { %v27_v2 = vld [vmem:[%s828_s1] sm:$0xff]  ;;  %564 = vmatprep.subr.mxu0 %v36_v0  ;;  %v28_v3 = vld [vmem:[%s828_s1 + $0x8] sm:$0xff]  ;;  %v44_v6 = vld [vmem:[%s831_s4 + $0x38] sm:$0xff] }
   0x3   :  { %568 = vmatprep.mubr.msk.f32.mxu0 %vm85_vm0, %v27_v2  ;;  %565 = vmatpush3.msra.mxu0 %v36_v0  ;;  %v42_v7 = vld [vmem:[%s831_s4 + $0x28] sm:$0xff]  ;;  %v43_v8 = vld [vmem:[%s831_s4 + $0x30] sm:$0xff]  ;;  %v30_v9 = vld [vmem:[%s828_s1 + $0x18] sm:$0xff] }
   0x4   :  { %566 = vmatprep.subr.mxu0 %v35_v1  ;;  %82 = vperm.xlu0 %631, %v44_v6   ;;  %v41_v10 = vld [vmem:[%s831_s4 + $0x20] sm:$0xff]  ;;  %v40_v12 = vld [vmem:[%s831_s4 + $0x18] sm:$0xff] }
   0x5   :  { %567 = vmatpush3.msra.mxu0 %v35_v1  ;;  %72 = vperm.xlu1 %632, %v42_v7   ;;  %v31_v11 = vld [vmem:[%s828_s1 + $0x20] sm:$0xff] }
   0x6   :  { %569 = vmatmul.mubr.msk.f32.vlgmr.msra.gmra.mxu0 %vm85_vm0, %v28_v3 }
   0x7   :  { %571 = vmatprep.mubr.msk.f32.mxu0 %vm85_vm0, %v29_v5 }
   0x8   :  { %77 = vperm.xlu0 %631, %v43_v8  }
   0x9   :  { %67 = vperm.xlu1 %632, %v41_v10  }
   0xa   :  { %572 = vmatmul.mubr.msk.f32.gmra.mxu0 %vm85_vm0, %v30_v9 }
   0xb   :  { %12 = vsyncpa [#allocation3], 0  ;;  %574 = vmatprep.mubr.msk.f32.mxu0 %vm85_vm0, %v31_v11  ;;  %v32_v13 = vld [vmem:[%s828_s1 + $0x28] sm:$0xff]  ;;  %v39_v14 = vld [vmem:[%s831_s4 + $0x10] sm:$0xff]  ;;  %vm279_vm1 = vcmask 523264   ;;  %v656_v4 = vmov 0.0  }
   0xc   :  { %v33_v15 = vld [vmem:[%s828_s1 + $0x30] sm:$0xff]  ;;  %62 = vperm.xlu0 %631, %v40_v12   ;;  %v38_v16 = vld [vmem:[%s831_s4 + $0x8] sm:$0xff]  ;;  %v34_v17 = vld [vmem:[%s828_s1 + $0x38] sm:$0xff]  ;;  %608 = vmatprep.subr.mxu0 %v656_v4  ;;  %vm657_vm2 = vmmov 0  }
   0xd   :  { %57 = vperm.xlu1 %632, %v39_v14   ;;  %v37_v18 = vld [vmem:[%s831_s4] sm:$0xff]  ;;  %v238_v19 = vld [vmem:[%s832_s5 + $0x38] sm:$0xff]  ;;  %v237_v20 = vld [vmem:[%s832_s5 + $0x30] sm:$0xff]  ;;  %s658_s4 = smov [#allocation2]  }
   0xe   :  { %575 = vmatmul.mubr.msk.f32.gmra.mxu0 %vm85_vm0, %v32_v13  ;;  %v236_v21 = vld [vmem:[%s832_s5 + $0x28] sm:$0xff]  ;;  %v235_v22 = vld [vmem:[%s832_s5 + $0x20] sm:$0xff]  ;;  %v234_v23 = vld [vmem:[%s832_s5 + $0x18] sm:$0xff]  ;;  %s504_s18 = sshll.u32 %s658_s4, 4  ;;  %s505_s18 = int_to_ptr.vmem [resolvable:$true] %s504_s18 }
   0xf   :  { %577 = vmatprep.mubr.msk.f32.mxu0 %vm85_vm0, %v33_v15  ;;  %v233_v24 = vld [vmem:[%s832_s5 + $0x10] sm:$0xff]  ;;  %v232_v25 = vld [vmem:[%s832_s5 + $0x8] sm:$0xff]  ;;  %v231_v26 = vld [vmem:[%s832_s5] sm:$0xff]  ;;  %s633_s19 = scalar_lea.vmem %s505_s18, 128  ;;  %p638_p1 = scmp.lt.s32.totalorder %s505_s18, %s505_s18 }
  0x10   :  { %52 = vperm.xlu0 %631, %v38_v16   ;;  %v418_v27 = vld [vmem:[%s833_s6] sm:$0xff]  ;;  %v224_v61 = vld [vmem:[%s829_s2 + $0x8] sm:$0xff]  ;;  %v225_v62 = vld [vmem:[%s829_s2 + $0x10] sm:$0xff]  ;;  %p634_p0 = scmp.ne.s32.totalorder %s505_s18, %s633_s19  ;;  %p639_p2 = scmp.lt.s32.totalorder %s633_s19, %s633_s19 }
  0x11   :  { %47 = vperm.xlu1 %632, %v37_v18   ;;  %v223_v28 = vld [vmem:[%s829_s2] sm:$0xff]  ;;  %v226_v63 = vld [vmem:[%s829_s2 + $0x18] sm:$0xff]  ;;  %v228_v1 = vld [vmem:[%s829_s2 + $0x28] sm:$0xff] }
  0x12   :  { %578 = vmatmul.mubr.msk.f32.gmra.mxu0 %vm85_vm0, %v34_v17  ;;  %596 = vmatprep.mubr.msk.f32.mxu1 %vm279_vm1, %v223_v28  ;;  %v227_v0 = vld [vmem:[%s829_s2 + $0x20] sm:$0xff]  ;;  %v229_v2 = vld [vmem:[%s829_s2 + $0x30] sm:$0xff]  ;;  %v230_v3 = vld [vmem:[%s829_s2 + $0x38] sm:$0xff]  ;;  %p640_p3 = por %p639_p2, %p638_p1 }
  0x13   :  { %624 = vmatprep.mubr.msk.f32.mxu0 %vm657_vm2, %v656_v4 }
  0x14   :  { %276 = vperm.xlu0 %631, %v238_v19   ;;  %p641_p4 = pnand %p640_p3, %p634_p0 }
  0x15   :  { %271 = vperm.xlu1 %632, %v237_v20  }
  0x18   :  { %266 = vperm.xlu0 %631, %v236_v21  }
  0x19   :  { %261 = vperm.xlu1 %632, %v235_v22  }
  0x1c   :  { %256 = vperm.xlu0 %631, %v234_v23  }
  0x1d   :  { %251 = vperm.xlu1 %632, %v233_v24  }
  0x20   :  { %246 = vperm.xlu0 %631, %v232_v25  }
  0x21   :  { %241 = vperm.xlu1 %632, %v231_v26  }
  0x24   :  { %421 = vperm.xlu0 %631, %v418_v27  }
  0x7f   :  { %v83_v31 = vpop.permute.xlu0 %82 }
  0x80   :  { %v73_v33 = vpop.permute.xlu1 %72 }
  0x83   :  { %v78_v36 = vpop.permute.xlu0 %77 }
  0x84   :  { %v68_v38 = vpop.permute.xlu1 %67 }
  0x87   :  { %v63_v45 = vpop.permute.xlu0 %62 }
  0x88   :  { %v58_v48 = vpop.permute.xlu1 %57 }
  0x8b   :  { %v53_v53 = vpop.permute.xlu0 %52 }
  0x8c   :  { %v48_v56 = vpop.permute.xlu1 %47 }
  0x8f   :  { %v277_v7 = vpop.permute.xlu0 %276 }
  0x90   :  { %v272_v9 = vpop.permute.xlu1 %271 }
  0x93   :  { %v267_v12 = vpop.permute.xlu0 %266 }
  0x94   :  { %v262_v14 = vpop.permute.xlu1 %261 }
  0x97   :  { %v257_v21 = vpop.permute.xlu0 %256 }
  0x98   :  { %v252_v24 = vpop.permute.xlu1 %251 }
  0xc6   :  { %v570_v29 = vpop.f32.mrf.mxu0 }
  0xc7   :  { %v182_v54 = vadd.f32 %v570_v29, %v53_v53  ;;  %v247_v29 = vpop.permute.xlu0 %246 }
  0xc8   :  { %v176_v30 = vpop.f32.mrf.mxu0 }
  0xc9   :  { %v177_v57 = vadd.f32 %v176_v30, %v48_v56  ;;  %v216_v59 = vmax.f32 %v182_v54, 0.0 }
  0xca   :  { %v573_v32 = vpop.f32.mrf.mxu0 }
  0xcb   :  { %v192_v49 = vadd.f32 %v573_v32, %v63_v45  ;;  %v215_v60 = vmax.f32 %v177_v57, 0.0  ;;  %v242_v32 = vpop.permute.xlu1 %241 }
  0xcc   :  { %v186_v34 = vpop.f32.mrf.mxu0 }
  0xcd   :  { %v187_v51 = vadd.f32 %v186_v34, %v58_v48  ;;  %v218_v55 = vmax.f32 %v192_v49, 0.0 }
  0xce   :  { %v576_v35 = vpop.f32.mrf.mxu0 }
  0xcf   :  { %v202_v42 = vadd.f32 %v576_v35, %v73_v33  ;;  %v217_v58 = vmax.f32 %v187_v51, 0.0 }
  0xd0   :  { %v196_v37 = vpop.f32.mrf.mxu0 }
  0xd1   :  { %v197_v46 = vadd.f32 %v196_v37, %v68_v38  ;;  %v220_v50 = vmax.f32 %v202_v42, 0.0  ;;  %v417_v37 = vld [vmem:[%s830_s3] sm:$0xff]  ;;  %v422_v38 = vpop.permute.xlu0 %421 }
  0xd2   :  { %v579_v39 = vpop.f32.mrf.mxu0 }
  0xd3   :  { %v212_v40 = vadd.f32 %v579_v39, %v83_v31  ;;  %v219_v52 = vmax.f32 %v197_v46, 0.0 }
  0xd4   :  { %v206_v41 = vpop.f32.mrf.mxu0 }
  0xd5   :  { %v222_v43 = vmax.f32 %v212_v40, 0.0  ;;  %v207_v44 = vadd.f32 %v206_v41, %v78_v36 }
  0xd7   :  { %v221_v47 = vmax.f32 %v207_v44, 0.0  ;;  %580 = vmatprep.subr.mxu1 %v222_v43 }
  0xd8   :  { %581 = vmatpush3.msra.mxu1 %v222_v43 }
  0xd9   :  { %582 = vmatprep.subr.mxu1 %v221_v47 }
  0xda   :  { %583 = vmatpush3.msra.mxu1 %v221_v47 }
  0xdb   :  { %584 = vmatprep.subr.mxu1 %v220_v50 }
  0xdc   :  { %585 = vmatpush3.msra.mxu1 %v220_v50 }
  0xdd   :  { %586 = vmatprep.subr.mxu1 %v219_v52 }
  0xde   :  { %587 = vmatpush3.msra.mxu1 %v219_v52 }
  0xdf   :  { %588 = vmatprep.subr.mxu1 %v218_v55 }
  0xe0   :  { %589 = vmatpush3.msra.mxu1 %v218_v55 }
  0xe1   :  { %590 = vmatprep.subr.mxu1 %v217_v58 }
  0xe2   :  { %591 = vmatpush3.msra.mxu1 %v217_v58 }
  0xe3   :  { %592 = vmatprep.subr.mxu1 %v216_v59 }
  0xe4   :  { %593 = vmatpush3.msra.mxu1 %v216_v59 }
  0xe5   :  { %594 = vmatprep.subr.mxu1 %v215_v60 }
  0xe6   :  { %595 = vmatpush3.msra.mxu1 %v215_v60 }
  0xe7   :  { %597 = vmatmul.mubr.msk.f32.vlgmr.msra.gmra.mxu1 %vm279_vm1, %v224_v61 }
  0xe8   :  { %599 = vmatprep.mubr.msk.f32.mxu1 %vm279_vm1, %v225_v62 }
  0xeb   :  { %600 = vmatmul.mubr.msk.f32.gmra.mxu1 %vm279_vm1, %v226_v63 }
  0xec   :  { %602 = vmatprep.mubr.msk.f32.mxu1 %vm279_vm1, %v227_v0 }
  0xef   :  { %603 = vmatmul.mubr.msk.f32.gmra.mxu1 %vm279_vm1, %v228_v1 }
  0xf0   :  { %605 = vmatprep.mubr.msk.f32.mxu1 %vm279_vm1, %v229_v2 }
  0xf3   :  { %606 = vmatmul.mubr.msk.f32.gmra.mxu1 %vm279_vm1, %v230_v3 }
 0x1a7   :  { %v598_v5 = vpop.f32.mrf.mxu1 }
 0x1a8   :  { %v376_v30 = vadd.f32 %v598_v5, %v247_v29 }
 0x1a9   :  { %v370_v6 = vpop.f32.mrf.mxu1 }
 0x1aa   :  { %v371_v33 = vadd.f32 %v370_v6, %v242_v32  ;;  %v410_v35 = vmax.f32 %v376_v30, 0.0 }
 0x1ab   :  { %v601_v8 = vpop.f32.mrf.mxu1 }
 0x1ac   :  { %v386_v25 = vadd.f32 %v601_v8, %v257_v21  ;;  %v409_v36 = vmax.f32 %v371_v33, 0.0 }
 0x1ad   :  { %v380_v10 = vpop.f32.mrf.mxu1 }
 0x1ae   :  { %v381_v27 = vadd.f32 %v380_v10, %v252_v24  ;;  %v412_v31 = vmax.f32 %v386_v25, 0.0 }
 0x1af   :  { %v604_v11 = vpop.f32.mrf.mxu1 }
 0x1b0   :  { %v396_v18 = vadd.f32 %v604_v11, %v267_v12  ;;  %v411_v34 = vmax.f32 %v381_v27, 0.0 }
 0x1b1   :  { %v390_v13 = vpop.f32.mrf.mxu1 }
 0x1b2   :  { %v391_v22 = vadd.f32 %v390_v13, %v262_v14  ;;  %v414_v26 = vmax.f32 %v396_v18, 0.0 }
 0x1b3   :  { %v607_v15 = vpop.f32.mrf.mxu1 }
 0x1b4   :  { %v406_v16 = vadd.f32 %v607_v15, %v277_v7  ;;  %v413_v28 = vmax.f32 %v391_v22, 0.0 }
 0x1b5   :  { %v400_v17 = vpop.f32.mrf.mxu1 }
 0x1b6   :  { %v416_v19 = vmax.f32 %v406_v16, 0.0  ;;  %v401_v20 = vadd.f32 %v400_v17, %v272_v9 }
 0x1b8   :  { %v415_v23 = vmax.f32 %v401_v20, 0.0  ;;  %609 = vmatpush3.msra.mxu0 %v416_v19 }
 0x1b9   :  { %610 = vmatprep.subr.mxu0 %v656_v4 }
 0x1ba   :  { %611 = vmatpush3.msra.mxu0 %v415_v23 }
 0x1bb   :  { %612 = vmatprep.subr.mxu0 %v656_v4 }
 0x1bc   :  { %613 = vmatpush3.msra.mxu0 %v414_v26 }
 0x1bd   :  { %614 = vmatprep.subr.mxu0 %v656_v4 }
 0x1be   :  { %615 = vmatpush3.msra.mxu0 %v413_v28 }
 0x1bf   :  { %616 = vmatprep.subr.mxu0 %v656_v4 }
 0x1c0   :  { %617 = vmatpush3.msra.mxu0 %v412_v31 }
 0x1c1   :  { %618 = vmatprep.subr.mxu0 %v656_v4 }
 0x1c2   :  { %619 = vmatpush3.msra.mxu0 %v411_v34 }
 0x1c3   :  { %620 = vmatprep.subr.mxu0 %v656_v4 }
 0x1c4   :  { %621 = vmatpush3.msra.mxu0 %v410_v35 }
 0x1c5   :  { %622 = vmatprep.subr.mxu0 %v656_v4 }
 0x1c6   :  { %623 = vmatpush3.msra.mxu0 %v409_v36 }
 0x1c7   :  { %625 = vmatmul.mubr.msk.f32.vlgmr.msra.gmra.mxu0 %vm279_vm1, %v417_v37 }
 0x287   :  { %v493_v39 = vpop.f32.mrf.mxu0 }
 0x288   :  { %v494_v40 = vadd.f32 %v493_v39, %v422_v38 }
 0x289   :  { %v626_v41 = vpop.f32.mrf.mxu0 }
 0x28a   :  { %497 = vst [vmem:[#allocation2] sm:$0xff] %v494_v40 }
 0x28b   :  { %644 = shalt.err (!%p641_p4)
}
 0x28c   :  { %507 = dma.vmem_to_hbm [thread:$0]  %s505_s18, 128, %s834_s7, [#allocation3]  }
 0x28d   :  { %653 = dma.done.wait [#allocation3], 128  }
 0x28e   :  { %654 = vsyncadd [#allocation3], 4294967168 }
 0x28f   :  { %511 = vsyncpa [#allocation3], 1 }

</bundles_post_ra>
